<compile_context>
chip_gen: v7x
topology: tpu7x:2x2x1
jax: 0.10.0
libtpu: 0.0.40
codegen_flags: <defaults>
</compile_context>

<pallas_src>
import math

import jax
import jax.numpy as jnp
from jax.experimental import pallas as pl
from jax.experimental.pallas import tpu as pltpu


# ----------------------------------------------------------------------------
# DCT filter construction (deterministic, matches get_dct_filter exactly).
# ----------------------------------------------------------------------------
def _build_filter(pos, freq, POS):
    result = math.cos(math.pi * freq * (pos + 0.5) / POS) / math.sqrt(POS)
    if freq == 0:
        return result
    return result * math.sqrt(2)


def get_dct_filter(tile_size_x, tile_size_y, component_x, component_y, channel):
    assert len(component_x) == len(component_y)
    assert channel % len(component_x) == 0
    c_part = channel // len(component_x)
    dct_filter = [[[0.0] * tile_size_y for _ in range(tile_size_x)]
                  for _ in range(channel)]
    for i, (u_x, v_y) in enumerate(zip(component_x, component_y)):
        for t_x in range(tile_size_x):
            for t_y in range(tile_size_y):
                val = (_build_filter(t_x, u_x, tile_size_x)
                       * _build_filter(t_y, v_y, tile_size_y))
                for c in range(i * c_part, (i + 1) * c_part):
                    dct_filter[c][t_x][t_y] = val
    return jnp.array(dct_filter, dtype=jnp.float32)  # (C, H, W)


# ----------------------------------------------------------------------------
# Kernels
# ----------------------------------------------------------------------------
def _dct_reduce_kernel(x_ref, w_ref, o_ref):
    # x_ref: (tn, tc, hw)  w_ref: (tc, hw)  o_ref: (tn, tc)
    x = x_ref[...].astype(jnp.float32)
    w = w_ref[...]
    # Multiply on VPU, reduce along the lane axis; kernel is HBM-bound.
    o_ref[...] = jnp.sum(x * w[None, :, :], axis=-1)


def _make_hw_tiled_kernel(hw, thw):
    """Accumulating kernel for the large-H*W fallback (grid axis 2 = hw chunks)."""
    ragged = (hw % thw) != 0

    def kernel(x_ref, w_ref, o_ref):
        hi = pl.program_id(2)

        @pl.when(hi == 0)
        def _():
            o_ref[...] = jnp.zeros_like(o_ref)

        x = x_ref[...].astype(jnp.float32)
        w = w_ref[...]
        prod = x * w[None, :, :]
        if ragged:
            # Mask out-of-range lanes of the (possibly partial) last hw chunk.
            lane = jax.lax.broadcasted_iota(jnp.int32, prod.shape, prod.ndim - 1)
            valid = (hi * thw + lane) < hw
            prod = jnp.where(valid, prod, 0.0)
        o_ref[...] += jnp.sum(prod, axis=-1)

    return kernel


# ----------------------------------------------------------------------------
# Tiling helpers
# ----------------------------------------------------------------------------
def _round_up(a, b):
    return (a + b - 1) // b * b


def _vmem_capacity_bytes():
    try:
        info = pltpu.get_tpu_info()
        cap = getattr(info, "vmem_capacity_bytes", None)
        if cap:
            return int(cap)
    except Exception:
        pass
    return 64 * 1024 * 1024  # conservative default (v7x-sized)


def _pick_channel_tile(C):
    # The output block's last dim must be a multiple of 128 or equal to C.
    if C % 128 == 0:
        return 256 if C % 256 == 0 else 128
    return C  # full-extent channel block (exempt from tiling rules)


def _batch_tile_options(N):
    # Valid batch tiles: divisors of N that are multiples of 8, plus N itself
    # (full-extent is always legal).  No batch padding of x is ever needed.
    opts = {N}
    for d in range(8, min(N, 1024) + 1, 8):
        if N % d == 0:
            opts.add(d)
    return sorted(opts)


# ----------------------------------------------------------------------------
# Forward wrapper
# ----------------------------------------------------------------------------
def dct_layer_forward(x, weight, *, hw_block=None):
    """x: (N, C, H, W) float; weight: (C, H, W) float32 -> (N, C) float32.

    hw_block: optional override of the spatial chunk size (multiple of 128);
    mainly for testing the large-H*W fallback path at small shapes.
    """
    assert x.ndim == 4, "x must been 4 dimensions, but got" + str(x.ndim)
    N, C, H, W = x.shape
    assert weight.shape == (C, H, W)
    hw = H * W

    x_flat = x.reshape(N, C, hw)                       # view, no copy / no pad
    w_flat = weight.reshape(C, hw).astype(jnp.float32)  # weight is tiny
    x_esz = jnp.dtype(x.dtype).itemsize

    # --- generation-aware budgets -----------------------------------------
    vmem_cap = _vmem_capacity_bytes()
    if vmem_cap >= 96 * 1024 * 1024:        # v5e / v6e: 128 MiB physical VMEM
        x_buf_budget = 20 * 1024 * 1024
        vmem_limit_cap = 100 * 1024 * 1024
    else:                                    # v7x: 64 MiB per TensorCore
        x_buf_budget = 10 * 1024 * 1024
        vmem_limit_cap = 48 * 1024 * 1024

    # --- tile selection (never pads x) -------------------------------------
    tc = _pick_channel_tile(C)
    tn_opts = _batch_tile_options(N)
    row_bytes_full = tc * hw * x_esz
    fit_full = [t for t in tn_opts if t * row_bytes_full <= x_buf_budget]

    if hw_block is not None and hw_block < hw:
        thw = max(128, hw_block - (hw_block % 128))        # forced (testing)
    elif fit_full:
        thw = hw                                            # single hw pass
    else:
        # Even the smallest legal batch tile over full hw blows the budget:
        # tile the hw axis in 128-lane chunks (robustness guard).
        tn0 = tn_opts[0]
        thw = (x_buf_budget // max(tn0 * tc * x_esz, 1)) // 128 * 128
        thw = max(128, min(thw, _round_up(hw, 128)))

    if thw >= hw:
        thw, n_hw = hw, 1
        tn = fit_full[-1] if fit_full else tn_opts[0]
        # Keep >=2 grid steps on a parallel axis for v7x's two TensorCores
        # when the channel axis has only one tile (small-C path).
        if C // tc == 1 and N // tn < 2:
            split = [t for t in fit_full
                     if N // t >= 2 and t * row_bytes_full >= (1 << 20)]
            if split:
                tn = split[-1]
    else:
        n_hw = -(-hw // thw)
        row_bytes = tc * thw * x_esz
        fit = [t for t in tn_opts if t * row_bytes <= x_buf_budget]
        tn = fit[-1] if fit else tn_opts[0]

    # --- VMEM accounting: double buffers + product intermediate + headroom --
    x_tile_b = tn * tc * thw * x_esz
    w_tile_b = tc * thw * 4
    o_tile_b = tn * tc * 4
    prod_b = tn * tc * thw * 4
    vmem_needed = 2 * (x_tile_b + w_tile_b + o_tile_b) + prod_b + (6 << 20)
    vmem_limit = int(min(max(vmem_needed, 32 * 1024 * 1024), vmem_limit_cap))

    cost = pl.CostEstimate(
        flops=2 * N * C * hw,
        transcendentals=0,
        bytes_accessed=x_flat.size * x_esz + w_flat.size * 4 + N * C * 4,
    )
    out_shape = jax.ShapeDtypeStruct((N, C), jnp.float32)

    if n_hw == 1:
        # Channel tiles outer, batch tiles inner: the weight block index is
        # constant across the inner axis, so it stays resident in VMEM.
        out = pl.pallas_call(
            _dct_reduce_kernel,
            out_shape=out_shape,
            grid=(C // tc, N // tn),
            in_specs=[
                pl.BlockSpec((tn, tc, hw), lambda ci, ni: (ni, ci, 0)),
                pl.BlockSpec((tc, hw), lambda ci, ni: (ci, 0)),
            ],
            out_specs=pl.BlockSpec((tn, tc), lambda ci, ni: (ni, ci)),
            compiler_params=pltpu.CompilerParams(
                dimension_semantics=("parallel", "parallel"),
                vmem_limit_bytes=vmem_limit,
            ),
            cost_estimate=cost,
        )(x_flat, w_flat)
    else:
        kernel = _make_hw_tiled_kernel(hw, thw)
        out = pl.pallas_call(
            kernel,
            out_shape=out_shape,
            grid=(C // tc, N // tn, n_hw),
            in_specs=[
                pl.BlockSpec((tn, tc, thw), lambda ci, ni, hi: (ni, ci, hi)),
                pl.BlockSpec((tc, thw), lambda ci, ni, hi: (ci, hi)),
            ],
            out_specs=pl.BlockSpec((tn, tc), lambda ci, ni, hi: (ni, ci)),
            compiler_params=pltpu.CompilerParams(
                dimension_semantics=("parallel", "parallel", "arbitrary"),
                vmem_limit_bytes=vmem_limit,
            ),
            cost_estimate=cost,
        )(x_flat, w_flat)

    return out


# ----------------------------------------------------------------------------
# Demo / self-check
# ----------------------------------------------------------------------------
if __name__ == "__main__":
    key = jax.random.PRNGKey(0)
    k1, k2, k3 = jax.random.split(key, 3)

    # Case 1: small shapes consistent with the module (small-C, full-extent path).
    N, C, H, W = 2, 4, 16, 16
    weight = get_dct_filter(H, W, [0, 1], [0, 1], C)            # (C, H, W)
    x = jax.random.normal(k1, (N, C, H, W), dtype=jnp.float32)
    out = jax.block_until_ready(dct_layer_forward(x, weight))
    ref = jnp.sum(x * weight[None], axis=(2, 3))
    assert out.shape == (N, C)
    assert jnp.allclose(out, ref, atol=1e-4, rtol=1e-4), "mismatch vs reference (case 1)"

    # Case 2: lane-dense channel tiling (C multiple of 128) + non-128 H*W (7x7),
    # which now streams unpadded via a full-extent hw block.
    N2, C2, H2, W2 = 4, 256, 7, 7
    weight2 = get_dct_filter(H2, W2, [0, 1, 0, 1], [0, 0, 1, 1], C2)
    x2 = jax.random.normal(k2, (N2, C2, H2, W2), dtype=jnp.float32)
    out2 = jax.block_until_ready(dct_layer_forward(x2, weight2))
    ref2 = jnp.sum(x2 * weight2[None], axis=(2, 3))
    assert out2.shape == (N2, C2)
    assert jnp.allclose(out2, ref2, atol=1e-4, rtol=1e-4), "mismatch vs reference (case 2)"

    # Case 3: exercise the large-H*W fallback (hw-chunked accumulation with a
    # ragged, masked final chunk) at a small size by forcing the chunk size.
    N3, C3, H3, W3 = 2, 4, 20, 20
    weight3 = get_dct_filter(H3, W3, [0, 1], [0, 1], C3)
    x3 = jax.random.normal(k3, (N3, C3, H3, W3), dtype=jnp.float32)
    out3 = jax.block_until_ready(dct_layer_forward(x3, weight3, hw_block=128))
    ref3 = jnp.sum(x3 * weight3[None], axis=(2, 3))
    assert out3.shape == (N3, C3)
    assert jnp.allclose(out3, ref3, atol=1e-4, rtol=1e-4), "mismatch vs reference (case 3)"

    print("KERNEL_OK")
</pallas_src>

<mosaic_0001>
module attributes {stable_mosaic.version = 11 : i64} {
  func.func @_dct_reduce_kernel(%arg0: i32, %arg1: i32, %arg2: memref<2x4x256xf32, #tpu.memory_space<vmem>>, %arg3: memref<4x256xf32, #tpu.memory_space<vmem>>, %arg4: memref<2x4xf32, #tpu.memory_space<vmem>>) attributes {dimension_semantics = [#tpu.dimension_semantics<parallel>, #tpu.dimension_semantics<parallel>], iteration_bounds = array<i64: 1, 1>, scalar_prefetch = 0 : i64, scratch_operands = 0 : i64, tpu.core_type = #tpu.core_type<tc>, window_params = [{transform_indices = @transform_0, window_bounds = array<i64: 2, 4, 256>}, {transform_indices = @transform_1, window_bounds = array<i64: 4, 256>}, {transform_indices = @transform_2, window_bounds = array<i64: 2, 4>}]} {
    %c0 = arith.constant 0 : index
    %c0_0 = arith.constant 0 : index
    %c0_1 = arith.constant 0 : index
    %0 = vector.load %arg2[%c0, %c0_0, %c0_1] : memref<2x4x256xf32, #tpu.memory_space<vmem>>, vector<2x4x256xf32>
    %c0_2 = arith.constant 0 : index
    %c0_3 = arith.constant 0 : index
    %1 = vector.load %arg3[%c0_2, %c0_3] : memref<4x256xf32, #tpu.memory_space<vmem>>, vector<4x256xf32>
    %2 = vector.shape_cast %1 : vector<4x256xf32> to vector<1x4x256xf32>
    %3 = vector.broadcast %2 : vector<1x4x256xf32> to vector<2x4x256xf32>
    %4 = arith.mulf %0, %3 : vector<2x4x256xf32>
    %cst = arith.constant dense<0.000000e+00> : vector<2x4xf32>
    %5 = vector.multi_reduction <add>, %4, %cst [2] : vector<2x4x256xf32> to vector<2x4xf32>
    %c0_4 = arith.constant 0 : index
    %c0_5 = arith.constant 0 : index
    %6 = vector.load %arg4[%c0_4, %c0_5] : memref<2x4xf32, #tpu.memory_space<vmem>>, vector<2x4xf32>
    tpu.vector_store %arg4[%c0_4, %c0_5], %5 {strides = array<i32>} : memref<2x4xf32, #tpu.memory_space<vmem>>, vector<2x4xf32>,
    return
  }
  func.func @transform_0(%arg0: i32, %arg1: i32) -> (i32, i32, i32) {
    %c0_i32 = arith.constant 0 : i32
    %c0_i32_0 = arith.constant 0 : i32
    return %arg1, %arg0, %c0_i32 : i32, i32, i32
  }
  func.func @transform_1(%arg0: i32, %arg1: i32) -> (i32, i32) {
    %c0_i32 = arith.constant 0 : i32
    %c0_i32_0 = arith.constant 0 : i32
    return %arg0, %c0_i32 : i32, i32
  }
  func.func @transform_2(%arg0: i32, %arg1: i32) -> (i32, i32) {
    %c0_i32 = arith.constant 0 : i32
    return %arg1, %arg0 : i32, i32
  }
}

</mosaic_0001>

<bundles_post_ra>
// kernel: tpu_custom_call.1
= control target key start
LH: loop header
LB: loop body
LE: loop exit
PB: predicated region body
PF: predicated region fallthrough
CT: control target
= control target key end

     0   :  { %7 = vsyncpa [#allocation3], 0  ;;  %s226_s0 = inlined_call_operand.hbm [shape: f32[2,4,256], index: 0, kind: input, shape index: {}]   ;;  %s227_s1 = inlined_call_operand.hbm [shape: f32[4,256], index: 1, kind: input, shape index: {}]   ;;  %s228_s2 = inlined_call_operand.hbm [shape: f32[2,4], index: 2, kind: output, shape index: {}]  }
   0x1   :  { %8 = vsyncpa [#allocation6], 0 }
   0x2   :  { %9 = vsyncpa [#allocation4], 0  ;;  %s170_s9 = smov [#allocation2]   ;;  %s98_s13 = scalar_lea.hbm %s226_s0, 256 }
   0x3   :  { %s15_s10 = sshll.u32 %s170_s9, 4  ;;  %p99_p0 = scmp.ne.s32.totalorder %s226_s0, %s98_s13  ;;  %s16_s10 = int_to_ptr.vmem [resolvable:$true] %s15_s10 }
   0x4   :  { %p102_p1 = scmp.lt.u32.totalorder %s98_s13, %s226_s0 }
   0x6   :  { %p104_p2 = pnand %p102_p1, %p99_p0 }
   0x8   :  { %107 = shalt.err (!%p104_p2)
}
   0x9   :  { %s108_s18 = scalar_lea.vmem %s16_s10, 256  ;;  %p113_p4 = scmp.lt.s32.totalorder %s16_s10, %s16_s10 }
   0xa   :  { %p109_p3 = scmp.ne.s32.totalorder %s16_s10, %s108_s18  ;;  %p114_p5 = scmp.lt.s32.totalorder %s108_s18, %s108_s18 }
   0xc   :  { %p115_p6 = por %p114_p5, %p113_p4 }
   0xe   :  { %p116_p7 = pnand %p115_p6, %p109_p3 }
  0x10   :  { %119 = shalt.err (!%p116_p7)
}
  0x11   :  { %s171_s19 = smov 128   ;;  %s172_s20 = smov 8  }
  0x12   :  { %21 = dma.hbm_to_vmem [thread:$0]  %s226_s0, 256, %s16_s10, [#allocation3], %s171_s19, %s171_s19, %s172_s20  }
  0x13   :  { %s173_s23 = smov [#allocation5]   ;;  %s120_s27 = scalar_lea.hbm %s227_s1, 128 }
  0x14   :  { %s28_s24 = sshll.u32 %s173_s23, 4  ;;  %p121_p8 = scmp.ne.s32.totalorder %s227_s1, %s120_s27  ;;  %s29_s24 = int_to_ptr.vmem [resolvable:$true] %s28_s24 }
  0x15   :  { %p124_p9 = scmp.lt.u32.totalorder %s120_s27, %s227_s1 }
  0x17   :  { %p126_p10 = pnand %p124_p9, %p121_p8 }
  0x19   :  { %129 = shalt.err (!%p126_p10)
}
  0x1a   :  { %s130_s4 = scalar_lea.vmem %s29_s24, 128  ;;  %p135_p12 = scmp.lt.s32.totalorder %s29_s24, %s29_s24 }
  0x1b   :  { %p131_p11 = scmp.ne.s32.totalorder %s29_s24, %s130_s4  ;;  %p136_p13 = scmp.lt.s32.totalorder %s130_s4, %s130_s4 }
  0x1d   :  { %p137_p0 = por %p136_p13, %p135_p12 }
  0x1f   :  { %p138_p1 = pnand %p137_p0, %p131_p11 }
  0x21   :  { %141 = shalt.err (!%p138_p1)
}
  0x22   :  { %31 = dma.hbm_to_vmem [thread:$0]  %s227_s1, 128, %s29_s24, [#allocation6]  }
  0x23   :  { %164 = dma.done.wait [#allocation3], 256  }
  0x24   :  { %165 = vsyncadd [#allocation3], 4294967040 }
  0x25   :  { %166 = dma.done.wait [#allocation6], 128  }
  0x26   :  { %167 = vsyncadd [#allocation6], 4294967168  ;;  %v38_v0 = vld [vmem:[#allocation2] sm:$0xff]  ;;  %v40_v1 = vld [vmem:[#allocation5] sm:$0xff]  ;;  %vm49_vm0 = vcmask 1043456   ;;  %v62_v13 = vlaneseq  ;;  %s174_s1 = smov [#allocation7]  }
  0x27   :  { %v39_v2 = vld [vmem:[#allocation2 + $0x8] sm:$0xff]  ;;  %v41_v3 = vmul.f32 %v40_v1, %v38_v0  ;;  %s83_s6 = sshll.u32 %s174_s1, 4  ;;  %vm72_vm1 = vcmask 1041409   ;;  %vm75_vm2 = vcmask 25600   ;;  %s84_s6 = int_to_ptr.vmem [resolvable:$true] %s83_s6 }
  0x28   :  { %v42_v4 = vmul.f32 %v40_v1, %v39_v2  ;;  %v63_v14 = vand.u32 127, %v62_v13  ;;  %v65_v15 = vshrl.u32 %v62_v13, 7  ;;  %s142_s7 = scalar_lea.vmem %s84_s6, 32  ;;  %p147_p3 = scmp.lt.s32.totalorder %s84_s6, %s84_s6 }
  0x29   :  { %v45_v5 = vcombine.high %v41_v3, %v41_v3  ;;  %v50_v6 = vsel %vm49_vm0, %v41_v3, 0.0  ;;  %p143_p2 = scmp.ne.s32.totalorder %s84_s6, %s142_s7  ;;  %p148_p4 = scmp.lt.s32.totalorder %s142_s7, %s142_s7 }
  0x2a   :  { %v46_v7 = vcombine.high %v42_v4, %v42_v4  ;;  %v55_v9 = vsel %vm49_vm0, %v42_v4, 0.0  ;;  %v66_v17 = vsub.s32 %v63_v14, %v65_v15 }
  0x2b   :  { %v51_v8 = vsel %vm49_vm0, %v45_v5, 0.0  ;;  %p149_p5 = por %p148_p4, %p147_p3 }
  0x2c   :  { %v56_v10 = vsel %vm49_vm0, %v46_v7, 0.0  ;;  %v52_v11 = vadd.f32 %v51_v8, %v50_v6 }
  0x2d   :  { %v57_v12 = vadd.f32 %v56_v10, %v55_v9  ;;  %p150_p6 = pnand %p149_p5, %p143_p2 }
  0x2e   :  { %53 = vadd.xlane.f32.xlu0 %v52_v11 }
  0x32   :  { %58 = vadd.xlane.f32.xlu0 %v57_v12 }
  0xbb   :  { %v54_v16 = vpop.xlane.xlu0 %53 }
  0xbc   :  { %v67_v19 = vrot.slane %v54_v16, %v66_v17 }
  0xbf   :  { %v59_v18 = vpop.xlane.xlu0 %58 }
  0xc0   :  { %v71_v20 = vrot.slane %v59_v18, %v66_v17 }
  0xc2   :  { %v73_v21 = vsel %vm72_vm1, %v71_v20, %v67_v19 }
  0xc3   :  { %76 = vst.msk [vmem:[#allocation7] sm:$0x3] %vm75_vm2, %v73_v21 }
  0xc4   :  { %153 = shalt.err (!%p150_p6)
}
  0xc5   :  { %s154_s10 = scalar_lea.hbm %s228_s2, 32 }
  0xc6   :  { %p155_p7 = scmp.ne.s32.totalorder %s228_s2, %s154_s10  ;;  %p158_p8 = scmp.lt.u32.totalorder %s154_s10, %s228_s2 }
  0xc8   :  { %p160_p9 = pnand %p158_p8, %p155_p7 }
  0xca   :  { %163 = shalt.err (!%p160_p9)
}
  0xcb   :  { %86 = dma.vmem_to_hbm [thread:$0]  %s84_s6, 32, %s228_s2, [#allocation4]  }
  0xcc   :  { %168 = dma.done.wait [#allocation4], 32  }
  0xcd   :  { %169 = vsyncadd [#allocation4], 4294967264 }
  0xce   :  { %90 = vsyncpa [#allocation3], 1 }
  0xcf   :  { %91 = vsyncpa [#allocation6], 1 }
  0xd0   :  { %92 = vsyncpa [#allocation4], 1 }

</bundles_post_ra>
